<compile_context>
chip_gen: v7x
topology: tpu7x:2x2x1
jax: 0.10.0
libtpu: 0.0.40
codegen_flags: <defaults>
</compile_context>

<pallas_src>
import jax
import jax.numpy as jnp
from jax.experimental import pallas as pl
from jax.experimental.pallas import tpu as pltpu


def _pointer_gen_kernel(dh_ref, cv_ref, w_ref, b_ref, out_ref):
    # dh/cv: [TILE_B, H] in native dtype; upcast in-kernel (free under DMA).
    dh = dh_ref[...].astype(jnp.float32)
    cv = cv_ref[...].astype(jnp.float32)

    w = w_ref[...]                      # [2, H] f32, resident across the grid
    w_d = w[0:1, :]                     # [1, H] broadcasts over rows
    w_c = w[1:2, :]

    # VPU multiply + cross-lane reduce; accumulate in f32.
    logits = jnp.sum(dh * w_d + cv * w_c, axis=-1, keepdims=True) + b_ref[0]
    out_ref[...] = jax.nn.sigmoid(logits).astype(out_ref.dtype)


def pointer_generator(decoder_hidden, context_vector, weight, bias, *, tile_b=None):
    """decoder_hidden/context_vector: [B, H] (any float dtype),
    weight: [1, 2H] (PyTorch nn.Linear layout), bias: [1]."""
    B, H = decoder_hidden.shape
    assert context_vector.shape == (B, H)
    assert weight.shape == (1, 2 * H)

    # Pack both weight halves into one lane-dense [2, H] block (row 0 = W_d,
    # row 1 = W_c) -- no transposes, no lane-sparse [H, 1] columns.
    w_packed = weight.reshape(2, H).astype(jnp.float32)
    b = bias.astype(jnp.float32)

    if tile_b is None:
        # Size for the smallest VMEM part (v7x: 64 MiB physical, 32 MiB
        # scoped default): 2 inputs x 2 pipeline buffers x tile under ~16 MiB.
        itemsize = jnp.dtype(decoder_hidden.dtype).itemsize
        budget_bytes = 16 * 1024 * 1024
        max_rows = max(8, budget_bytes // (4 * H * itemsize))
        tile_b = B if B <= max_rows else (max_rows // 8) * 8
    tile_b = min(tile_b, B)

    grid = (pl.cdiv(B, tile_b),)

    return pl.pallas_call(
        _pointer_gen_kernel,
        out_shape=jax.ShapeDtypeStruct((B, 1), decoder_hidden.dtype),
        grid=grid,
        in_specs=[
            pl.BlockSpec((tile_b, H), lambda i: (i, 0)),   # decoder_hidden tile
            pl.BlockSpec((tile_b, H), lambda i: (i, 0)),   # context_vector tile
            pl.BlockSpec((2, H), lambda i: (0, 0)),        # packed weights (resident)
            pl.BlockSpec(memory_space=pltpu.SMEM),         # scalar bias
        ],
        out_specs=pl.BlockSpec((tile_b, 1), lambda i: (i, 0)),
        compiler_params=pltpu.CompilerParams(
            dimension_semantics=("parallel",),
            vmem_limit_bytes=32 * 1024 * 1024,
        ),
    )(decoder_hidden, context_vector, w_packed, b)


if __name__ == "__main__":
    key = jax.random.PRNGKey(0)
    k_dh, k_cv, k_w, k_b = jax.random.split(key, 4)

    B, H = 8, 32
    decoder_hidden = jax.random.normal(k_dh, (B, H), dtype=jnp.float32)
    context_vector = jax.random.normal(k_cv, (B, H), dtype=jnp.float32)

    # Deterministic nn.Linear(2H, 1) params (uniform(-1/sqrt(2H), 1/sqrt(2H))).
    bound = 1.0 / jnp.sqrt(2.0 * H)
    weight = jax.random.uniform(k_w, (1, 2 * H), minval=-bound, maxval=bound,
                                dtype=jnp.float32)
    bias = jax.random.uniform(k_b, (1,), minval=-bound, maxval=bound,
                              dtype=jnp.float32)

    p_gen = pointer_generator(decoder_hidden, context_vector, weight, bias)
    p_gen = jax.block_until_ready(p_gen)

    # Pure-JAX reference (concat form).
    concat = jnp.concatenate([decoder_hidden, context_vector], axis=-1)
    ref = jax.nn.sigmoid(concat @ weight.T + bias)
    assert p_gen.shape == (B, 1)
    assert jnp.allclose(p_gen, ref, atol=1e-5, rtol=1e-5)

    print("KERNEL_OK")
</pallas_src>

<mosaic_0001>
module attributes {stable_mosaic.version = 11 : i64} {
  func.func @_pointer_gen_kernel(%arg0: i32, %arg1: memref<8x32xf32, #tpu.memory_space<vmem>>, %arg2: memref<8x32xf32, #tpu.memory_space<vmem>>, %arg3: memref<2x32xf32, #tpu.memory_space<vmem>>, %arg4: memref<1xf32, #tpu.memory_space<smem>>, %arg5: memref<8x1xf32, #tpu.memory_space<vmem>>) attributes {dimension_semantics = [#tpu.dimension_semantics<parallel>], iteration_bounds = array<i64: 1>, scalar_prefetch = 0 : i64, scratch_operands = 0 : i64, tpu.core_type = #tpu.core_type<tc>, window_params = [{transform_indices = @transform_0, window_bounds = array<i64: 8, 32>}, {transform_indices = @transform_1, window_bounds = array<i64: 8, 32>}, {pipeline_mode = #tpu.pipeline_mode<synchronous>, transform_indices = @transform_2, window_bounds = array<i64: 2, 32>}, {transform_indices = @transform_3, window_bounds = array<i64: 1>}, {transform_indices = @transform_4, window_bounds = array<i64: 8, 1>}]} {
    %c0 = arith.constant 0 : index
    %c0_0 = arith.constant 0 : index
    %0 = vector.load %arg1[%c0, %c0_0] : memref<8x32xf32, #tpu.memory_space<vmem>>, vector<8x32xf32>
    %c0_1 = arith.constant 0 : index
    %c0_2 = arith.constant 0 : index
    %1 = vector.load %arg2[%c0_1, %c0_2] : memref<8x32xf32, #tpu.memory_space<vmem>>, vector<8x32xf32>
    %c0_3 = arith.constant 0 : index
    %c0_4 = arith.constant 0 : index
    %2 = vector.load %arg3[%c0_3, %c0_4] : memref<2x32xf32, #tpu.memory_space<vmem>>, vector<2x32xf32>
    %3 = vector.extract_strided_slice %2 {offsets = [0, 0], sizes = [1, 32], strides = [1, 1]} : vector<2x32xf32> to vector<1x32xf32>
    %4 = vector.extract_strided_slice %2 {offsets = [1, 0], sizes = [1, 32], strides = [1, 1]} : vector<2x32xf32> to vector<1x32xf32>
    %5 = vector.broadcast %3 : vector<1x32xf32> to vector<8x32xf32>
    %6 = arith.mulf %0, %5 : vector<8x32xf32>
    %7 = vector.broadcast %4 : vector<1x32xf32> to vector<8x32xf32>
    %8 = arith.mulf %1, %7 : vector<8x32xf32>
    %9 = arith.addf %6, %8 : vector<8x32xf32>
    %cst = arith.constant dense<0.000000e+00> : vector<8xf32>
    %10 = vector.multi_reduction <add>, %9, %cst [1] : vector<8x32xf32> to vector<8xf32>
    %11 = vector.shape_cast %10 : vector<8xf32> to vector<8x1xf32>
    %c0_5 = arith.constant 0 : index
    %12 = memref.load %arg4[%c0_5] : memref<1xf32, #tpu.memory_space<smem>>
    %13 = vector.broadcast %12 : f32 to vector<8x1xf32>
    %14 = arith.addf %11, %13 : vector<8x1xf32>
    %15 = arith.negf %14 : vector<8x1xf32>
    %16 = math.exp %15 : vector<8x1xf32>
    %cst_6 = arith.constant 1.000000e+00 : f32
    %17 = vector.broadcast %cst_6 : f32 to vector<8x1xf32>
    %18 = arith.addf %17, %16 : vector<8x1xf32>
    %19 = arith.divf %17, %18 : vector<8x1xf32>
    %c0_7 = arith.constant 0 : index
    %c0_8 = arith.constant 0 : index
    %20 = vector.load %arg5[%c0_7, %c0_8] : memref<8x1xf32, #tpu.memory_space<vmem>>, vector<8x1xf32>
    tpu.vector_store %arg5[%c0_7, %c0_8], %19 {strides = array<i32>} : memref<8x1xf32, #tpu.memory_space<vmem>>, vector<8x1xf32>,
    return
  }
  func.func @transform_0(%arg0: i32) -> (i32, i32) {
    %c0_i32 = arith.constant 0 : i32
    %c0_i32_0 = arith.constant 0 : i32
    return %arg0, %c0_i32 : i32, i32
  }
  func.func @transform_1(%arg0: i32) -> (i32, i32) {
    %c0_i32 = arith.constant 0 : i32
    %c0_i32_0 = arith.constant 0 : i32
    return %arg0, %c0_i32 : i32, i32
  }
  func.func @transform_2(%arg0: i32) -> (i32, i32) {
    %c0_i32 = arith.constant 0 : i32
    %c0_i32_0 = arith.constant 0 : i32
    %c0_i32_1 = arith.constant 0 : i32
    return %c0_i32, %c0_i32_0 : i32, i32
  }
  func.func @transform_3(%arg0: i32) -> i32 {
    %c0_i32 = arith.constant 0 : i32
    %c0_i32_0 = arith.constant 0 : i32
    return %c0_i32 : i32
  }
  func.func @transform_4(%arg0: i32) -> (i32, i32) {
    %c0_i32 = arith.constant 0 : i32
    %c0_i32_0 = arith.constant 0 : i32
    return %arg0, %c0_i32 : i32, i32
  }
}

</mosaic_0001>

<bundles_post_ra>
// kernel: tpu_custom_call.1
= control target key start
LH: loop header
LB: loop body
LE: loop exit
PB: predicated region body
PF: predicated region fallthrough
CT: control target
= control target key end

     0   :  { %10 = vsyncpa [#allocation4], 0  ;;  %s192_s0 = inlined_call_operand.hbm [shape: f32[8,32], index: 0, kind: input, shape index: {}]   ;;  %s193_s1 = inlined_call_operand.hbm [shape: f32[8,32], index: 1, kind: input, shape index: {}]   ;;  %s194_s2 = inlined_call_operand.vmem [shape: f32[2,32], index: 2, kind: input, shape index: {}]   ;;  %s195_s3 = inlined_call_operand.<no memory space> [shape: f32[1], index: 3, kind: input, shape index: {}]   ;;  %s196_s4 = inlined_call_operand.vmem [shape: f32[8,1], index: 4, kind: output, shape index: {}]  }
   0x1   :  { %11 = vsyncpa [#allocation6], 0  ;;  %s132_s15 = smov [#allocation3]   ;;  %s133_s17 = smov [#allocation5]  }
   0x2   :  { %s18_s16 = sshll.u32 %s132_s15, 4  ;;  %s28_s18 = sshll.u32 %s133_s17, 4  ;;  %s19_s16 = int_to_ptr.vmem [resolvable:$true] %s18_s16  ;;  %s29_s18 = int_to_ptr.vmem [resolvable:$true] %s28_s18 }
   0x3   :  { %s84_s21 = scalar_lea.hbm %s192_s0, 128 }
   0x4   :  { %p85_p0 = scmp.ne.s32.totalorder %s192_s0, %s84_s21  ;;  %p88_p1 = scmp.lt.u32.totalorder %s84_s21, %s192_s0 }
   0x6   :  { %p90_p2 = pnand %p88_p1, %p85_p0 }
   0x8   :  { %93 = shalt.err (!%p90_p2)
}
   0x9   :  { %s94_s26 = scalar_lea.vmem %s19_s16, 128  ;;  %p99_p4 = scmp.lt.s32.totalorder %s19_s16, %s19_s16 }
   0xa   :  { %p95_p3 = scmp.ne.s32.totalorder %s19_s16, %s94_s26  ;;  %p100_p5 = scmp.lt.s32.totalorder %s94_s26, %s94_s26 }
   0xc   :  { %p101_p6 = por %p100_p5, %p99_p4 }
   0xe   :  { %p102_p7 = pnand %p101_p6, %p95_p3 }
  0x10   :  { %105 = shalt.err (!%p102_p7)
}
  0x11   :  { %21 = dma.hbm_to_vmem [thread:$0]  %s192_s0, 128, %s19_s16, [#allocation4]  }
  0x12   :  { %s106_s5 = scalar_lea.hbm %s193_s1, 128 }
  0x13   :  { %p107_p8 = scmp.ne.s32.totalorder %s193_s1, %s106_s5  ;;  %p110_p9 = scmp.lt.u32.totalorder %s106_s5, %s193_s1 }
  0x15   :  { %p112_p10 = pnand %p110_p9, %p107_p8 }
  0x17   :  { %115 = shalt.err (!%p112_p10)
}
  0x18   :  { %s116_s10 = scalar_lea.vmem %s29_s18, 128  ;;  %p121_p12 = scmp.lt.s32.totalorder %s29_s18, %s29_s18 }
  0x19   :  { %p117_p11 = scmp.ne.s32.totalorder %s29_s18, %s116_s10  ;;  %p122_p13 = scmp.lt.s32.totalorder %s116_s10, %s116_s10 }
  0x1b   :  { %p123_p0 = por %p122_p13, %p121_p12 }
  0x1d   :  { %p124_p1 = pnand %p123_p0, %p117_p11 }
  0x1f   :  { %127 = shalt.err (!%p124_p1)
}
  0x20   :  { %31 = dma.hbm_to_vmem [thread:$0]  %s193_s1, 128, %s29_s18, [#allocation6]  }
  0x21   :  { %128 = dma.done.wait [#allocation4], 128  }
  0x22   :  { %129 = vsyncadd [#allocation4], 4294967168 }
  0x23   :  { %130 = dma.done.wait [#allocation6], 128  }
  0x24   :  { %131 = vsyncadd [#allocation6], 4294967168  ;;  %v45_v0 = vlaneseq  ;;  %v42_v4 = vld [vmem:[#allocation3] sm:$0xff]  ;;  %v43_v5 = vld [vmem:[#allocation5] sm:$0xff]  ;;  %vm56_vm0 = vcmask 261120   ;;  %v61_v13 = vstv %s195_s3  ;;  %vm69_vm1 = vcmask 7168  }
  0x25   :  { %v44_v6 = vld [vmem:[%s194_s2] sm:$0x3] }
  0x26   :  { %v46_v1 = vshrl.u32 %v45_v0, 7 }
  0x28   :  { %v47_v2 = vsub.s32 0, %v46_v1  ;;  %v52_v3 = vsub.s32 1, %v46_v1 }
  0x2a   :  { %v48_v7 = vrot.slane %v44_v6, %v47_v2  ;;  %v53_v8 = vrot.slane %v44_v6, %v52_v3 }
  0x2c   :  { %v49_v9 = vmul.f32 %v48_v7, %v42_v4  ;;  %v54_v10 = vmul.f32 %v53_v8, %v43_v5 }
  0x2e   :  { %v55_v11 = vadd.f32 %v54_v10, %v49_v9 }
  0x30   :  { %v57_v12 = vsel %vm56_vm0, %v55_v11, 0.0 }
  0x31   :  { %58 = vadd.xlane.f32.xlu0 %v57_v12 }
  0xbe   :  { %v59_v14 = vpop.xlane.xlu0 %58 }
  0xbf   :  { %v62_v15 = vadd.f32 %v61_v13, %v59_v14 }
  0xc1   :  { %v77_v16 = vmul.f32 -1.442695, %v62_v15 }
  0xc3   :  { %80 = vpow2.f32 %v77_v16 }
  0xcd   :  { %v81_v17 = vpop.eup %80 }
  0xce   :  { %v66_v18 = vadd.f32 1.0, %v81_v17 }
  0xd0   :  { %82 = vrcp.f32 %v66_v18 }
  0xda   :  { %v83_v19 = vpop.eup %82 }
  0xdb   :  { %70 = vst.msk [vmem:[%s196_s4] sm:$0xff] %vm69_vm1, %v83_v19 }
  0xdc   :  { %75 = vsyncpa [#allocation4], 1 }
  0xdd   :  { %76 = vsyncpa [#allocation6], 1 }

</bundles_post_ra>
